<compile_context>
chip_gen: v7x
topology: tpu7x:2x2x1
jax: 0.10.0
libtpu: 0.0.40
codegen_flags: <defaults>
</compile_context>

<pallas_src>
import functools

import jax
import jax.numpy as jnp
from jax import lax
from jax.experimental import pallas as pl
from jax.experimental.pallas import tpu as pltpu

_LANE = 128


def _round_up(n, m):
    return ((n + m - 1) // m) * m


def _largest_divisor_leq(n, cap):
    for d in range(min(n, cap), 0, -1):
        if n % d == 0:
            return d
    return 1


def _vmem_capacity_bytes():
    """Physical VMEM per TensorCore (128 MiB on v5e/v6e, 64 MiB on v7x)."""
    try:
        return int(pltpu.get_tpu_info().vmem_capacity_bytes)
    except Exception:
        return 64 * 1024 * 1024  # conservative (v7x-sized) fallback


def _max_lane_tile(vmem_cap):
    # 128 MiB parts (v5e/v6e) can afford bigger lane tiles than 64 MiB v7x.
    return 1024 if vmem_cap >= (96 << 20) else 512


def _lane_plan(modes1, modes2, vmem_cap=None):
    """Padded lane extent L for the flattened (2*m1*m2) mode axis.

    L is always a multiple of 128.  If no reasonably large 128-multiple divides
    the minimal padding, pad L up to a multiple of the target lane tile so the
    kernel never falls back to 128-lane DMA tiles.  Padded lanes are zero in
    both operands, so results are unchanged.
    """
    if vmem_cap is None:
        vmem_cap = _vmem_capacity_bytes()
    max_tile_l = _max_lane_tile(vmem_cap)
    m_tot = 2 * modes1 * modes2
    lanes_min = _round_up(m_tot, _LANE)
    if lanes_min <= max_tile_l:
        return lanes_min
    for cand in range(max_tile_l, _LANE - 1, -_LANE):
        if lanes_min % cand == 0:
            if cand >= 384:
                return lanes_min
            break
    return _round_up(m_tot, max_tile_l)


def _pick_lane_tile(lanes, max_tile_l):
    for cand in range(max_tile_l, _LANE - 1, -_LANE):
        if lanes % cand == 0:
            return cand
    return _LANE


def _pick_co_tile(co, cap):
    if co <= cap:
        return co
    for cand in range(cap - cap % 8, 7, -8):
        if co % cand == 0:
            return cand
    return co  # no mult-of-8 divisor <= cap: full-Co block is always legal


def _tiling_plan(b, ci, co, lanes):
    """Budget-first derivation of DMA tiles, Ci chunk and register sub-tiles."""
    vmem_cap = _vmem_capacity_bytes()
    max_tile_l = _max_lane_tile(vmem_cap)
    tile_l = _pick_lane_tile(lanes, max_tile_l)
    tile_co = _pick_co_tile(co, 256 if vmem_cap >= (96 << 20) else 128)

    budget = int(vmem_cap * 0.55)  # double-buffered blocks must fit here

    def blocks_bytes(cic, tco, tl):
        # real+imag planes, double-buffered a/w/o blocks, f32
        return 4 * 2 * 2 * (cic * b * tl + cic * tco * tl + b * tco * tl)

    # Ci chunk: largest divisor of Ci whose blocks fit the budget (on v7x a
    # full-Ci weight block alone can exceed the 64 MiB VMEM).
    ci_chunk = ci
    while ci_chunk > 1 and blocks_bytes(ci_chunk, tile_co, tile_l) > budget:
        ci_chunk = _largest_divisor_leq(ci, ci_chunk - 1)
    # Still too big -> shrink the Co tile, then the lane tile.
    while (blocks_bytes(ci_chunk, tile_co, tile_l) > budget
           and tile_co % 16 == 0 and tile_co > 8):
        tile_co //= 2
    while (blocks_bytes(ci_chunk, tile_co, tile_l) > budget
           and tile_l % 256 == 0 and tile_l > 128):
        tile_l //= 2

    # v7x megacore: make sure at least one "parallel" grid axis has >= 2 blocks.
    if (lanes // tile_l) * (co // tile_co) < 2:
        if tile_co % 16 == 0:
            tile_co //= 2
        elif tile_l % 256 == 0:
            tile_l //= 2

    # Register sub-tile: accumulators + operands stay inside the 64-vreg file.
    sub_l = 256 if tile_l % 256 == 0 else 128
    if tile_co % 8 == 0:
        sub_co = 8
    elif tile_co <= 16:
        sub_co = tile_co
    else:
        sub_co = _largest_divisor_leq(tile_co, 16)

    need = blocks_bytes(ci_chunk, tile_co, tile_l)
    vmem_limit = int(min(vmem_cap * 0.8, max(32 << 20, need + (16 << 20))))

    return dict(tile_l=tile_l, tile_co=tile_co, ci_chunk=ci_chunk,
                sub_co=sub_co, sub_l=sub_l, vmem_limit=vmem_limit)


def _compl_mul_kernel(ar_ref, ai_ref, wr_ref, wi_ref, or_ref, oi_ref,
                      *, sub_co, sub_l):
    """Complex channel contraction for one (lane, Co, Ci-chunk) grid step.

    Block shapes:
      ar/ai : (ci_chunk, B,       tile_L)   activations (real / imag)
      wr/wi : (ci_chunk, tile_Co, tile_L)   weights     (real / imag)
      or/oi : (B,        tile_Co, tile_L)   outputs, accumulated across the
                                            innermost (arbitrary) Ci grid axis.
    """
    ci_chunk, b, tile_l = ar_ref.shape
    tile_co = wr_ref.shape[1]
    n_sub_co = tile_co // sub_co
    n_sub_l = tile_l // sub_l

    ci_idx = pl.program_id(2)
    is_first = ci_idx == 0
    not_first = ci_idx > 0

    if ci_chunk <= 8:
        unroll = ci_chunk
    elif ci_chunk % 4 == 0:
        unroll = 4
    elif ci_chunk % 2 == 0:
        unroll = 2
    else:
        unroll = 1

    def do_sub_tile(bb, co0, l0):
        # Register-resident accumulators: 2 * (sub_co*sub_l/1024) vregs.
        def ci_step(i, carry):
            acc_r, acc_i = carry
            a_pr = ar_ref.at[i]          # (B, tile_L) view of channel i
            a_pi = ai_ref.at[i]
            w_pr = wr_ref.at[i]          # (tile_Co, tile_L) view of channel i
            w_pi = wi_ref.at[i]
            # One activation row, broadcast once across the sub_co output
            # sublanes (replicated-sublane layout; vld slots have slack).
            a_r = jnp.broadcast_to(a_pr[pl.ds(bb, 1), pl.ds(l0, sub_l)],
                                   (sub_co, sub_l))
            a_i = jnp.broadcast_to(a_pi[pl.ds(bb, 1), pl.ds(l0, sub_l)],
                                   (sub_co, sub_l))
            w_r = w_pr[pl.ds(co0, sub_co), pl.ds(l0, sub_l)]
            w_i = w_pi[pl.ds(co0, sub_co), pl.ds(l0, sub_l)]
            # 4-multiply complex MAC (fewer VALU ops than Karatsuba here).
            acc_r = acc_r + (a_r * w_r - a_i * w_i)
            acc_i = acc_i + (a_r * w_i + a_i * w_r)
            return acc_r, acc_i

        zero = jnp.zeros((sub_co, sub_l), jnp.float32)
        acc_r, acc_i = lax.fori_loop(0, ci_chunk, ci_step, (zero, zero),
                                     unroll=unroll)

        out_r = or_ref.at[bb, pl.ds(co0, sub_co), pl.ds(l0, sub_l)]
        out_i = oi_ref.at[bb, pl.ds(co0, sub_co), pl.ds(l0, sub_l)]

        @pl.when(is_first)
        def _():
            out_r[...] = acc_r
            out_i[...] = acc_i

        @pl.when(not_first)
        def _():
            out_r[...] = out_r[...] + acc_r
            out_i[...] = out_i[...] + acc_i

    if b * n_sub_co * n_sub_l <= 16:
        # Few sub-tiles: static unroll gives the scheduler full visibility.
        for bb in range(b):
            for ic in range(n_sub_co):
                for il in range(n_sub_l):
                    do_sub_tile(bb, ic * sub_co, il * sub_l)
    else:
        # Many sub-tiles: bounded code size / live ranges via in-kernel loops.
        for bb in range(b):
            @pl.loop(0, n_sub_co)
            def _(ic, bb=bb):
                @pl.loop(0, n_sub_l)
                def _(il, ic=ic, bb=bb):
                    l0 = pl.multiple_of(il * sub_l, sub_l)
                    co0 = ic * sub_co
                    if sub_co % 8 == 0:
                        co0 = pl.multiple_of(co0, 8)
                    do_sub_tile(bb, co0, l0)


def _compl_mul2d_pallas(a_r, a_i, w_r, w_i, *, tile_l, tile_co, ci_chunk,
                        sub_co, sub_l, vmem_limit):
    """a_*: (Ci, B, L); w_*: (Ci, Co, L) -> (B, Co, L) complex contraction."""
    ci, b, lanes = a_r.shape
    co = w_r.shape[1]
    n_l = lanes // tile_l
    n_co = co // tile_co
    n_ci = ci // ci_chunk

    a_spec = pl.BlockSpec((ci_chunk, b, tile_l), lambda l, c, k: (k, 0, l))
    w_spec = pl.BlockSpec((ci_chunk, tile_co, tile_l), lambda l, c, k: (k, c, l))
    o_spec = pl.BlockSpec((b, tile_co, tile_l), lambda l, c, k: (0, c, l))

    out_shape = (jax.ShapeDtypeStruct((b, co, lanes), jnp.float32),
                 jax.ShapeDtypeStruct((b, co, lanes), jnp.float32))

    cost = pl.CostEstimate(
        flops=8 * b * ci * co * lanes,
        transcendentals=0,
        bytes_accessed=4 * 2 * (n_co * ci * b * lanes + ci * co * lanes
                                + b * co * lanes),
    )

    kernel = functools.partial(_compl_mul_kernel, sub_co=sub_co, sub_l=sub_l)

    return pl.pallas_call(
        kernel,
        out_shape=out_shape,
        grid_spec=pltpu.PrefetchScalarGridSpec(
            num_scalar_prefetch=0,
            grid=(n_l, n_co, n_ci),
            in_specs=[a_spec, a_spec, w_spec, w_spec],
            out_specs=(o_spec, o_spec),
        ),
        compiler_params=pltpu.CompilerParams(
            dimension_semantics=("parallel", "parallel", "arbitrary"),
            vmem_limit_bytes=int(vmem_limit)),
        cost_estimate=cost,
    )(a_r, a_i, w_r, w_i)


def pack_spectral_weights(weights1, weights2):
    """Pack complex FNO weights (Ci, Co, m1, m2) x2 into lane-dense real/imag
    planes of shape (Ci, Co, L).  Runs once at parameter-init time."""
    ci, co, m1, m2 = weights1.shape
    m_tot = 2 * m1 * m2
    lanes = _lane_plan(m1, m2)
    w = jnp.concatenate([weights1, weights2], axis=2).reshape(ci, co, m_tot)
    pad = lanes - m_tot
    w_r = jnp.pad(jnp.real(w).astype(jnp.float32), ((0, 0), (0, 0), (0, pad)))
    w_i = jnp.pad(jnp.imag(w).astype(jnp.float32), ((0, 0), (0, 0), (0, pad)))
    return w_r, w_i


def spectral_conv2d(x, w_r, w_i, modes1, modes2):
    """Forward pass of SpectralConv2d.

    x        : (B, C_in, H, W) float32 (NCHW, same as PyTorch)
    w_r, w_i : (C_in, C_out, L) float32, from pack_spectral_weights
    returns  : (B, C_out, H, W) float32
    """
    b, ci, h, w = x.shape
    co = w_r.shape[1]
    lanes = w_r.shape[2]
    m_tot = 2 * modes1 * modes2

    # TODO(synk): rfft2 / irfft2 have no clean Pallas equivalent; plain JAX (XLA FFT).
    x_ft = jnp.fft.rfft2(x)                                   # (B, Ci, H, Wf) c64

    # Low + high frequency row slabs, channel axis leading, modes flattened
    # into one lane-dense axis padded to `lanes`.
    a = jnp.concatenate([x_ft[:, :, :modes1, :modes2],
                         x_ft[:, :, h - modes1:, :modes2]], axis=2)   # (B,Ci,2m1,m2)
    a = jnp.transpose(a, (1, 0, 2, 3)).reshape(ci, b, m_tot)          # (Ci,B,2M)
    pad = lanes - m_tot
    a_r = jnp.pad(jnp.real(a).astype(jnp.float32), ((0, 0), (0, 0), (0, pad)))
    a_i = jnp.pad(jnp.imag(a).astype(jnp.float32), ((0, 0), (0, 0), (0, pad)))

    plan = _tiling_plan(b, ci, co, lanes)
    o_r, o_i = _compl_mul2d_pallas(a_r, a_i, w_r, w_i, **plan)        # (B,Co,L) x2

    o = (o_r[..., :m_tot] + 1j * o_i[..., :m_tot]).astype(jnp.complex64)
    o = o.reshape(b, co, 2 * modes1, modes2)

    wf = w // 2 + 1
    out_ft = jnp.zeros((b, co, h, wf), dtype=jnp.complex64)
    out_ft = out_ft.at[:, :, :modes1, :modes2].set(o[:, :, :modes1])
    out_ft = out_ft.at[:, :, h - modes1:, :modes2].set(o[:, :, modes1:])

    return jnp.fft.irfft2(out_ft, s=(h, w)).astype(jnp.float32)


def _reference_forward(x, weights1, weights2, modes1, modes2):
    """Pure-JAX reference (mirrors the PyTorch code 1:1) for validation."""
    b, ci, h, w = x.shape
    co = weights1.shape[1]
    x_ft = jnp.fft.rfft2(x)
    out_ft = jnp.zeros((b, co, h, w // 2 + 1), dtype=jnp.complex64)
    out_ft = out_ft.at[:, :, :modes1, :modes2].set(
        jnp.einsum('bixy,ioxy->boxy', x_ft[:, :, :modes1, :modes2], weights1))
    out_ft = out_ft.at[:, :, h - modes1:, :modes2].set(
        jnp.einsum('bixy,ioxy->boxy', x_ft[:, :, h - modes1:, :modes2], weights2))
    return jnp.fft.irfft2(out_ft, s=(h, w))


if __name__ == "__main__":
    B, Ci, Co = 2, 4, 4
    H, W = 16, 16
    modes1, modes2 = 4, 4

    key = jax.random.PRNGKey(0)
    kx, k1r, k1i, k2r, k2i = jax.random.split(key, 5)

    x = jax.random.normal(kx, (B, Ci, H, W), dtype=jnp.float32)

    # Deterministic parameter init, matching nn.Parameter(scale * rand(..., cfloat))
    scale = 1.0 / (Ci * Co)
    weights1 = (scale * (jax.random.uniform(k1r, (Ci, Co, modes1, modes2))
                         + 1j * jax.random.uniform(k1i, (Ci, Co, modes1, modes2)))
                ).astype(jnp.complex64)
    weights2 = (scale * (jax.random.uniform(k2r, (Ci, Co, modes1, modes2))
                         + 1j * jax.random.uniform(k2i, (Ci, Co, modes1, modes2)))
                ).astype(jnp.complex64)

    # Weight packing happens once (parameter-init time in a real model).
    w_r, w_i = pack_spectral_weights(weights1, weights2)

    fwd = jax.jit(functools.partial(spectral_conv2d, modes1=modes1, modes2=modes2))
    out = jax.block_until_ready(fwd(x, w_r, w_i))

    ref = jax.block_until_ready(
        _reference_forward(x, weights1, weights2, modes1, modes2))

    assert out.shape == (B, Co, H, W), out.shape
    assert jnp.allclose(out, ref, atol=1e-4, rtol=1e-4), \
        float(jnp.max(jnp.abs(out - ref)))

    print("KERNEL_OK")
</pallas_src>

<mosaic_0001>
module attributes {stable_mosaic.version = 11 : i64} {
  func.func @_compl_mul_kernel(%arg0: i32, %arg1: i32, %arg2: i32, %arg3: memref<4x2x128xf32, #tpu.memory_space<vmem>>, %arg4: memref<4x2x128xf32, #tpu.memory_space<vmem>>, %arg5: memref<4x4x128xf32, #tpu.memory_space<vmem>>, %arg6: memref<4x4x128xf32, #tpu.memory_space<vmem>>, %arg7: memref<2x4x128xf32, #tpu.memory_space<vmem>>, %arg8: memref<2x4x128xf32, #tpu.memory_space<vmem>>) attributes {dimension_semantics = [#tpu.dimension_semantics<parallel>, #tpu.dimension_semantics<parallel>, #tpu.dimension_semantics<arbitrary>], iteration_bounds = array<i64: 1, 1, 1>, scalar_prefetch = 0 : i64, scratch_operands = 0 : i64, tpu.core_type = #tpu.core_type<tc>, window_params = [{transform_indices = @transform_0, window_bounds = array<i64: 4, 2, 128>}, {transform_indices = @transform_1, window_bounds = array<i64: 4, 2, 128>}, {transform_indices = @transform_2, window_bounds = array<i64: 4, 4, 128>}, {transform_indices = @transform_3, window_bounds = array<i64: 4, 4, 128>}, {transform_indices = @transform_4, window_bounds = array<i64: 2, 4, 128>}, {transform_indices = @transform_5, window_bounds = array<i64: 2, 4, 128>}]} {
    %c0_i32 = arith.constant 0 : i32
    %0 = arith.cmpi eq, %arg2, %c0_i32 : i32
    %c0_i32_0 = arith.constant 0 : i32
    %1 = arith.cmpi sgt, %arg2, %c0_i32_0 : i32
    %cst = arith.constant 0.000000e+00 : f32
    %2 = vector.broadcast %cst : f32 to vector<4x128xf32>
    %c0_i32_1 = arith.constant 0 : i32
    %c0_i32_2 = arith.constant 0 : i32
    %c0_i32_3 = arith.constant 0 : i32
    %3 = tpu.memref_slice %arg3[%c0_i32_1, %c0_i32_2, %c0_i32_3] : memref<4x2x128xf32, #tpu.memory_space<vmem>> -> memref<1x2x128xf32, #tpu.memory_space<vmem>>
    %4 = tpu.memref_squeeze %3 : memref<1x2x128xf32, #tpu.memory_space<vmem>> -> memref<2x128xf32, #tpu.memory_space<vmem>>
    %c0 = arith.constant 0 : index
    %c0_4 = arith.constant 0 : index
    %5 = vector.load %4[%c0, %c0_4] : memref<2x128xf32, #tpu.memory_space<vmem>>, vector<1x128xf32>
    %6 = vector.shape_cast %5 : vector<1x128xf32> to vector<1x128xf32>
    %7 = vector.broadcast %6 : vector<1x128xf32> to vector<4x128xf32>
    %c0_i32_5 = arith.constant 0 : i32
    %c0_i32_6 = arith.constant 0 : i32
    %8 = tpu.memref_slice %arg4[%c0_i32_1, %c0_i32_5, %c0_i32_6] : memref<4x2x128xf32, #tpu.memory_space<vmem>> -> memref<1x2x128xf32, #tpu.memory_space<vmem>>
    %9 = tpu.memref_squeeze %8 : memref<1x2x128xf32, #tpu.memory_space<vmem>> -> memref<2x128xf32, #tpu.memory_space<vmem>>
    %c0_7 = arith.constant 0 : index
    %c0_8 = arith.constant 0 : index
    %10 = vector.load %9[%c0_7, %c0_8] : memref<2x128xf32, #tpu.memory_space<vmem>>, vector<1x128xf32>
    %11 = vector.shape_cast %10 : vector<1x128xf32> to vector<1x128xf32>
    %12 = vector.broadcast %11 : vector<1x128xf32> to vector<4x128xf32>
    %c0_i32_9 = arith.constant 0 : i32
    %c0_i32_10 = arith.constant 0 : i32
    %13 = tpu.memref_slice %arg5[%c0_i32_1, %c0_i32_9, %c0_i32_10] : memref<4x4x128xf32, #tpu.memory_space<vmem>> -> memref<1x4x128xf32, #tpu.memory_space<vmem>>
    %14 = tpu.memref_squeeze %13 : memref<1x4x128xf32, #tpu.memory_space<vmem>> -> memref<4x128xf32, #tpu.memory_space<vmem>>
    %c0_11 = arith.constant 0 : index
    %c0_12 = arith.constant 0 : index
    %15 = vector.load %14[%c0_11, %c0_12] : memref<4x128xf32, #tpu.memory_space<vmem>>, vector<4x128xf32>
    %c0_i32_13 = arith.constant 0 : i32
    %c0_i32_14 = arith.constant 0 : i32
    %16 = tpu.memref_slice %arg6[%c0_i32_1, %c0_i32_13, %c0_i32_14] : memref<4x4x128xf32, #tpu.memory_space<vmem>> -> memref<1x4x128xf32, #tpu.memory_space<vmem>>
    %17 = tpu.memref_squeeze %16 : memref<1x4x128xf32, #tpu.memory_space<vmem>> -> memref<4x128xf32, #tpu.memory_space<vmem>>
    %c0_15 = arith.constant 0 : index
    %c0_16 = arith.constant 0 : index
    %18 = vector.load %17[%c0_15, %c0_16] : memref<4x128xf32, #tpu.memory_space<vmem>>, vector<4x128xf32>
    %19 = arith.mulf %7, %15 : vector<4x128xf32>
    %20 = arith.mulf %12, %18 : vector<4x128xf32>
    %21 = arith.subf %19, %20 : vector<4x128xf32>
    %22 = arith.addf %2, %21 : vector<4x128xf32>
    %23 = arith.mulf %7, %18 : vector<4x128xf32>
    %24 = arith.mulf %12, %15 : vector<4x128xf32>
    %25 = arith.addf %23, %24 : vector<4x128xf32>
    %26 = arith.addf %2, %25 : vector<4x128xf32>
    %c1_i32 = arith.constant 1 : i32
    %c0_i32_17 = arith.constant 0 : i32
    %c0_i32_18 = arith.constant 0 : i32
    %27 = tpu.memref_slice %arg3[%c1_i32, %c0_i32_17, %c0_i32_18] : memref<4x2x128xf32, #tpu.memory_space<vmem>> -> memref<1x2x128xf32, #tpu.memory_space<vmem>>
    %28 = tpu.memref_squeeze %27 : memref<1x2x128xf32, #tpu.memory_space<vmem>> -> memref<2x128xf32, #tpu.memory_space<vmem>>
    %c0_19 = arith.constant 0 : index
    %c0_20 = arith.constant 0 : index
    %29 = vector.load %28[%c0_19, %c0_20] : memref<2x128xf32, #tpu.memory_space<vmem>>, vector<1x128xf32>
    %30 = vector.shape_cast %29 : vector<1x128xf32> to vector<1x128xf32>
    %31 = vector.broadcast %30 : vector<1x128xf32> to vector<4x128xf32>
    %c0_i32_21 = arith.constant 0 : i32
    %c0_i32_22 = arith.constant 0 : i32
    %32 = tpu.memref_slice %arg4[%c1_i32, %c0_i32_21, %c0_i32_22] : memref<4x2x128xf32, #tpu.memory_space<vmem>> -> memref<1x2x128xf32, #tpu.memory_space<vmem>>
    %33 = tpu.memref_squeeze %32 : memref<1x2x128xf32, #tpu.memory_space<vmem>> -> memref<2x128xf32, #tpu.memory_space<vmem>>
    %c0_23 = arith.constant 0 : index
    %c0_24 = arith.constant 0 : index
    %34 = vector.load %33[%c0_23, %c0_24] : memref<2x128xf32, #tpu.memory_space<vmem>>, vector<1x128xf32>
    %35 = vector.shape_cast %34 : vector<1x128xf32> to vector<1x128xf32>
    %36 = vector.broadcast %35 : vector<1x128xf32> to vector<4x128xf32>
    %c0_i32_25 = arith.constant 0 : i32
    %c0_i32_26 = arith.constant 0 : i32
    %37 = tpu.memref_slice %arg5[%c1_i32, %c0_i32_25, %c0_i32_26] : memref<4x4x128xf32, #tpu.memory_space<vmem>> -> memref<1x4x128xf32, #tpu.memory_space<vmem>>
    %38 = tpu.memref_squeeze %37 : memref<1x4x128xf32, #tpu.memory_space<vmem>> -> memref<4x128xf32, #tpu.memory_space<vmem>>
    %c0_27 = arith.constant 0 : index
    %c0_28 = arith.constant 0 : index
    %39 = vector.load %38[%c0_27, %c0_28] : memref<4x128xf32, #tpu.memory_space<vmem>>, vector<4x128xf32>
    %c0_i32_29 = arith.constant 0 : i32
    %c0_i32_30 = arith.constant 0 : i32
    %40 = tpu.memref_slice %arg6[%c1_i32, %c0_i32_29, %c0_i32_30] : memref<4x4x128xf32, #tpu.memory_space<vmem>> -> memref<1x4x128xf32, #tpu.memory_space<vmem>>
    %41 = tpu.memref_squeeze %40 : memref<1x4x128xf32, #tpu.memory_space<vmem>> -> memref<4x128xf32, #tpu.memory_space<vmem>>
    %c0_31 = arith.constant 0 : index
    %c0_32 = arith.constant 0 : index
    %42 = vector.load %41[%c0_31, %c0_32] : memref<4x128xf32, #tpu.memory_space<vmem>>, vector<4x128xf32>
    %43 = arith.mulf %31, %39 : vector<4x128xf32>
    %44 = arith.mulf %36, %42 : vector<4x128xf32>
    %45 = arith.subf %43, %44 : vector<4x128xf32>
    %46 = arith.addf %22, %45 : vector<4x128xf32>
    %47 = arith.mulf %31, %42 : vector<4x128xf32>
    %48 = arith.mulf %36, %39 : vector<4x128xf32>
    %49 = arith.addf %47, %48 : vector<4x128xf32>
    %50 = arith.addf %26, %49 : vector<4x128xf32>
    %c2_i32 = arith.constant 2 : i32
    %c0_i32_33 = arith.constant 0 : i32
    %c0_i32_34 = arith.constant 0 : i32
    %51 = tpu.memref_slice %arg3[%c2_i32, %c0_i32_33, %c0_i32_34] : memref<4x2x128xf32, #tpu.memory_space<vmem>> -> memref<1x2x128xf32, #tpu.memory_space<vmem>>
    %52 = tpu.memref_squeeze %51 : memref<1x2x128xf32, #tpu.memory_space<vmem>> -> memref<2x128xf32, #tpu.memory_space<vmem>>
    %c0_35 = arith.constant 0 : index
    %c0_36 = arith.constant 0 : index
    %53 = vector.load %52[%c0_35, %c0_36] : memref<2x128xf32, #tpu.memory_space<vmem>>, vector<1x128xf32>
    %54 = vector.shape_cast %53 : vector<1x128xf32> to vector<1x128xf32>
    %55 = vector.broadcast %54 : vector<1x128xf32> to vector<4x128xf32>
    %c0_i32_37 = arith.constant 0 : i32
    %c0_i32_38 = arith.constant 0 : i32
    %56 = tpu.memref_slice %arg4[%c2_i32, %c0_i32_37, %c0_i32_38] : memref<4x2x128xf32, #tpu.memory_space<vmem>> -> memref<1x2x128xf32, #tpu.memory_space<vmem>>
    %57 = tpu.memref_squeeze %56 : memref<1x2x128xf32, #tpu.memory_space<vmem>> -> memref<2x128xf32, #tpu.memory_space<vmem>>
    %c0_39 = arith.constant 0 : index
    %c0_40 = arith.constant 0 : index
    %58 = vector.load %57[%c0_39, %c0_40] : memref<2x128xf32, #tpu.memory_space<vmem>>, vector<1x128xf32>
    %59 = vector.shape_cast %58 : vector<1x128xf32> to vector<1x128xf32>
    %60 = vector.broadcast %59 : vector<1x128xf32> to vector<4x128xf32>
    %c0_i32_41 = arith.constant 0 : i32
    %c0_i32_42 = arith.constant 0 : i32
    %61 = tpu.memref_slice %arg5[%c2_i32, %c0_i32_41, %c0_i32_42] : memref<4x4x128xf32, #tpu.memory_space<vmem>> -> memref<1x4x128xf32, #tpu.memory_space<vmem>>
    %62 = tpu.memref_squeeze %61 : memref<1x4x128xf32, #tpu.memory_space<vmem>> -> memref<4x128xf32, #tpu.memory_space<vmem>>
    %c0_43 = arith.constant 0 : index
    %c0_44 = arith.constant 0 : index
    %63 = vector.load %62[%c0_43, %c0_44] : memref<4x128xf32, #tpu.memory_space<vmem>>, vector<4x128xf32>
    %c0_i32_45 = arith.constant 0 : i32
    %c0_i32_46 = arith.constant 0 : i32
    %64 = tpu.memref_slice %arg6[%c2_i32, %c0_i32_45, %c0_i32_46] : memref<4x4x128xf32, #tpu.memory_space<vmem>> -> memref<1x4x128xf32, #tpu.memory_space<vmem>>
    %65 = tpu.memref_squeeze %64 : memref<1x4x128xf32, #tpu.memory_space<vmem>> -> memref<4x128xf32, #tpu.memory_space<vmem>>
    %c0_47 = arith.constant 0 : index
    %c0_48 = arith.constant 0 : index
    %66 = vector.load %65[%c0_47, %c0_48] : memref<4x128xf32, #tpu.memory_space<vmem>>, vector<4x128xf32>
    %67 = arith.mulf %55, %63 : vector<4x128xf32>
    %68 = arith.mulf %60, %66 : vector<4x128xf32>
    %69 = arith.subf %67, %68 : vector<4x128xf32>
    %70 = arith.addf %46, %69 : vector<4x128xf32>
    %71 = arith.mulf %55, %66 : vector<4x128xf32>
    %72 = arith.mulf %60, %63 : vector<4x128xf32>
    %73 = arith.addf %71, %72 : vector<4x128xf32>
    %74 = arith.addf %50, %73 : vector<4x128xf32>
    %c3_i32 = arith.constant 3 : i32
    %c0_i32_49 = arith.constant 0 : i32
    %c0_i32_50 = arith.constant 0 : i32
    %75 = tpu.memref_slice %arg3[%c3_i32, %c0_i32_49, %c0_i32_50] : memref<4x2x128xf32, #tpu.memory_space<vmem>> -> memref<1x2x128xf32, #tpu.memory_space<vmem>>
    %76 = tpu.memref_squeeze %75 : memref<1x2x128xf32, #tpu.memory_space<vmem>> -> memref<2x128xf32, #tpu.memory_space<vmem>>
    %c0_51 = arith.constant 0 : index
    %c0_52 = arith.constant 0 : index
    %77 = vector.load %76[%c0_51, %c0_52] : memref<2x128xf32, #tpu.memory_space<vmem>>, vector<1x128xf32>
    %78 = vector.shape_cast %77 : vector<1x128xf32> to vector<1x128xf32>
    %79 = vector.broadcast %78 : vector<1x128xf32> to vector<4x128xf32>
    %c0_i32_53 = arith.constant 0 : i32
    %c0_i32_54 = arith.constant 0 : i32
    %80 = tpu.memref_slice %arg4[%c3_i32, %c0_i32_53, %c0_i32_54] : memref<4x2x128xf32, #tpu.memory_space<vmem>> -> memref<1x2x128xf32, #tpu.memory_space<vmem>>
    %81 = tpu.memref_squeeze %80 : memref<1x2x128xf32, #tpu.memory_space<vmem>> -> memref<2x128xf32, #tpu.memory_space<vmem>>
    %c0_55 = arith.constant 0 : index
    %c0_56 = arith.constant 0 : index
    %82 = vector.load %81[%c0_55, %c0_56] : memref<2x128xf32, #tpu.memory_space<vmem>>, vector<1x128xf32>
    %83 = vector.shape_cast %82 : vector<1x128xf32> to vector<1x128xf32>
    %84 = vector.broadcast %83 : vector<1x128xf32> to vector<4x128xf32>
    %c0_i32_57 = arith.constant 0 : i32
    %c0_i32_58 = arith.constant 0 : i32
    %85 = tpu.memref_slice %arg5[%c3_i32, %c0_i32_57, %c0_i32_58] : memref<4x4x128xf32, #tpu.memory_space<vmem>> -> memref<1x4x128xf32, #tpu.memory_space<vmem>>
    %86 = tpu.memref_squeeze %85 : memref<1x4x128xf32, #tpu.memory_space<vmem>> -> memref<4x128xf32, #tpu.memory_space<vmem>>
    %c0_59 = arith.constant 0 : index
    %c0_60 = arith.constant 0 : index
    %87 = vector.load %86[%c0_59, %c0_60] : memref<4x128xf32, #tpu.memory_space<vmem>>, vector<4x128xf32>
    %c0_i32_61 = arith.constant 0 : i32
    %c0_i32_62 = arith.constant 0 : i32
    %88 = tpu.memref_slice %arg6[%c3_i32, %c0_i32_61, %c0_i32_62] : memref<4x4x128xf32, #tpu.memory_space<vmem>> -> memref<1x4x128xf32, #tpu.memory_space<vmem>>
    %89 = tpu.memref_squeeze %88 : memref<1x4x128xf32, #tpu.memory_space<vmem>> -> memref<4x128xf32, #tpu.memory_space<vmem>>
    %c0_63 = arith.constant 0 : index
    %c0_64 = arith.constant 0 : index
    %90 = vector.load %89[%c0_63, %c0_64] : memref<4x128xf32, #tpu.memory_space<vmem>>, vector<4x128xf32>
    %91 = arith.mulf %79, %87 : vector<4x128xf32>
    %92 = arith.mulf %84, %90 : vector<4x128xf32>
    %93 = arith.subf %91, %92 : vector<4x128xf32>
    %94 = arith.addf %70, %93 : vector<4x128xf32>
    %95 = arith.mulf %79, %90 : vector<4x128xf32>
    %96 = arith.mulf %84, %87 : vector<4x128xf32>
    %97 = arith.addf %95, %96 : vector<4x128xf32>
    %98 = arith.addf %74, %97 : vector<4x128xf32>
    %c4_i32 = arith.constant 4 : i32
    %99 = arith.extui %0 : i1 to i32
    %c0_i32_65 = arith.constant 0 : i32
    %c0_i32_66 = arith.constant 0 : i32
    %c0_i32_67 = arith.constant 0 : i32
    %100 = arith.cmpi ne, %99, %c0_i32_67 : i32
    scf.if %100 {
      %204 = arith.index_cast %c0_i32_65 : i32 to index
      %c0_146 = arith.constant 0 : index
      %c0_147 = arith.constant 0 : index
      %205 = vector.load %arg7[%204, %c0_146, %c0_147] : memref<2x4x128xf32, #tpu.memory_space<vmem>>, vector<1x4x128xf32>
      %206 = vector.shape_cast %205 : vector<1x4x128xf32> to vector<4x128xf32>
      %207 = vector.shape_cast %94 : vector<4x128xf32> to vector<1x4x128xf32>
      tpu.vector_store %arg7[%204, %c0_146, %c0_147], %207 {strides = array<i32>} : memref<2x4x128xf32, #tpu.memory_space<vmem>>, vector<1x4x128xf32>,
      %208 = arith.index_cast %c0_i32_66 : i32 to index
      %c0_148 = arith.constant 0 : index
      %c0_149 = arith.constant 0 : index
      %209 = vector.load %arg8[%208, %c0_148, %c0_149] : memref<2x4x128xf32, #tpu.memory_space<vmem>>, vector<1x4x128xf32>
      %210 = vector.shape_cast %209 : vector<1x4x128xf32> to vector<4x128xf32>
      %211 = vector.shape_cast %98 : vector<4x128xf32> to vector<1x4x128xf32>
      tpu.vector_store %arg8[%208, %c0_148, %c0_149], %211 {strides = array<i32>} : memref<2x4x128xf32, #tpu.memory_space<vmem>>, vector<1x4x128xf32>,
    } else {
    }
    %101 = arith.extui %1 : i1 to i32
    %c0_i32_68 = arith.constant 0 : i32
    %c0_i32_69 = arith.constant 0 : i32
    %c0_i32_70 = arith.constant 0 : i32
    %102 = arith.cmpi ne, %101, %c0_i32_70 : i32
    scf.if %102 {
      %204 = arith.index_cast %c0_i32_68 : i32 to index
      %c0_146 = arith.constant 0 : index
      %c0_147 = arith.constant 0 : index
      %205 = vector.load %arg7[%204, %c0_146, %c0_147] : memref<2x4x128xf32, #tpu.memory_space<vmem>>, vector<1x4x128xf32>
      %206 = vector.shape_cast %205 : vector<1x4x128xf32> to vector<4x128xf32>
      %207 = arith.addf %206, %94 : vector<4x128xf32>
      %208 = arith.index_cast %c0_i32_68 : i32 to index
      %c0_148 = arith.constant 0 : index
      %c0_149 = arith.constant 0 : index
      %209 = vector.load %arg7[%208, %c0_148, %c0_149] : memref<2x4x128xf32, #tpu.memory_space<vmem>>, vector<1x4x128xf32>
      %210 = vector.shape_cast %209 : vector<1x4x128xf32> to vector<4x128xf32>
      %211 = vector.shape_cast %207 : vector<4x128xf32> to vector<1x4x128xf32>
      tpu.vector_store %arg7[%208, %c0_148, %c0_149], %211 {strides = array<i32>} : memref<2x4x128xf32, #tpu.memory_space<vmem>>, vector<1x4x128xf32>,
      %212 = arith.index_cast %c0_i32_69 : i32 to index
      %c0_150 = arith.constant 0 : index
      %c0_151 = arith.constant 0 : index
      %213 = vector.load %arg8[%212, %c0_150, %c0_151] : memref<2x4x128xf32, #tpu.memory_space<vmem>>, vector<1x4x128xf32>
      %214 = vector.shape_cast %213 : vector<1x4x128xf32> to vector<4x128xf32>
      %215 = arith.addf %214, %98 : vector<4x128xf32>
      %216 = arith.index_cast %c0_i32_69 : i32 to index
      %c0_152 = arith.constant 0 : index
      %c0_153 = arith.constant 0 : index
      %217 = vector.load %arg8[%216, %c0_152, %c0_153] : memref<2x4x128xf32, #tpu.memory_space<vmem>>, vector<1x4x128xf32>
      %218 = vector.shape_cast %217 : vector<1x4x128xf32> to vector<4x128xf32>
      %219 = vector.shape_cast %215 : vector<4x128xf32> to vector<1x4x128xf32>
      tpu.vector_store %arg8[%216, %c0_152, %c0_153], %219 {strides = array<i32>} : memref<2x4x128xf32, #tpu.memory_space<vmem>>, vector<1x4x128xf32>,
    } else {
    }
    %cst_71 = arith.constant 0.000000e+00 : f32
    %103 = vector.broadcast %cst_71 : f32 to vector<4x128xf32>
    %c0_i32_72 = arith.constant 0 : i32
    %c0_i32_73 = arith.constant 0 : i32
    %c0_i32_74 = arith.constant 0 : i32
    %104 = tpu.memref_slice %arg3[%c0_i32_72, %c0_i32_73, %c0_i32_74] : memref<4x2x128xf32, #tpu.memory_space<vmem>> -> memref<1x2x128xf32, #tpu.memory_space<vmem>>
    %105 = tpu.memref_squeeze %104 : memref<1x2x128xf32, #tpu.memory_space<vmem>> -> memref<2x128xf32, #tpu.memory_space<vmem>>
    %c1 = arith.constant 1 : index
    %c0_75 = arith.constant 0 : index
    %106 = vector.load %105[%c1, %c0_75] : memref<2x128xf32, #tpu.memory_space<vmem>>, vector<1x128xf32>
    %107 = vector.shape_cast %106 : vector<1x128xf32> to vector<1x128xf32>
    %108 = vector.broadcast %107 : vector<1x128xf32> to vector<4x128xf32>
    %c0_i32_76 = arith.constant 0 : i32
    %c0_i32_77 = arith.constant 0 : i32
    %109 = tpu.memref_slice %arg4[%c0_i32_72, %c0_i32_76, %c0_i32_77] : memref<4x2x128xf32, #tpu.memory_space<vmem>> -> memref<1x2x128xf32, #tpu.memory_space<vmem>>
    %110 = tpu.memref_squeeze %109 : memref<1x2x128xf32, #tpu.memory_space<vmem>> -> memref<2x128xf32, #tpu.memory_space<vmem>>
    %c1_78 = arith.constant 1 : index
    %c0_79 = arith.constant 0 : index
    %111 = vector.load %110[%c1_78, %c0_79] : memref<2x128xf32, #tpu.memory_space<vmem>>, vector<1x128xf32>
    %112 = vector.shape_cast %111 : vector<1x128xf32> to vector<1x128xf32>
    %113 = vector.broadcast %112 : vector<1x128xf32> to vector<4x128xf32>
    %c0_i32_80 = arith.constant 0 : i32
    %c0_i32_81 = arith.constant 0 : i32
    %114 = tpu.memref_slice %arg5[%c0_i32_72, %c0_i32_80, %c0_i32_81] : memref<4x4x128xf32, #tpu.memory_space<vmem>> -> memref<1x4x128xf32, #tpu.memory_space<vmem>>
    %115 = tpu.memref_squeeze %114 : memref<1x4x128xf32, #tpu.memory_space<vmem>> -> memref<4x128xf32, #tpu.memory_space<vmem>>
    %c0_82 = arith.constant 0 : index
    %c0_83 = arith.constant 0 : index
    %116 = vector.load %115[%c0_82, %c0_83] : memref<4x128xf32, #tpu.memory_space<vmem>>, vector<4x128xf32>
    %c0_i32_84 = arith.constant 0 : i32
    %c0_i32_85 = arith.constant 0 : i32
    %117 = tpu.memref_slice %arg6[%c0_i32_72, %c0_i32_84, %c0_i32_85] : memref<4x4x128xf32, #tpu.memory_space<vmem>> -> memref<1x4x128xf32, #tpu.memory_space<vmem>>
    %118 = tpu.memref_squeeze %117 : memref<1x4x128xf32, #tpu.memory_space<vmem>> -> memref<4x128xf32, #tpu.memory_space<vmem>>
    %c0_86 = arith.constant 0 : index
    %c0_87 = arith.constant 0 : index
    %119 = vector.load %118[%c0_86, %c0_87] : memref<4x128xf32, #tpu.memory_space<vmem>>, vector<4x128xf32>
    %120 = arith.mulf %108, %116 : vector<4x128xf32>
    %121 = arith.mulf %113, %119 : vector<4x128xf32>
    %122 = arith.subf %120, %121 : vector<4x128xf32>
    %123 = arith.addf %103, %122 : vector<4x128xf32>
    %124 = arith.mulf %108, %119 : vector<4x128xf32>
    %125 = arith.mulf %113, %116 : vector<4x128xf32>
    %126 = arith.addf %124, %125 : vector<4x128xf32>
    %127 = arith.addf %103, %126 : vector<4x128xf32>
    %c1_i32_88 = arith.constant 1 : i32
    %c0_i32_89 = arith.constant 0 : i32
    %c0_i32_90 = arith.constant 0 : i32
    %128 = tpu.memref_slice %arg3[%c1_i32_88, %c0_i32_89, %c0_i32_90] : memref<4x2x128xf32, #tpu.memory_space<vmem>> -> memref<1x2x128xf32, #tpu.memory_space<vmem>>
    %129 = tpu.memref_squeeze %128 : memref<1x2x128xf32, #tpu.memory_space<vmem>> -> memref<2x128xf32, #tpu.memory_space<vmem>>
    %c1_91 = arith.constant 1 : index
    %c0_92 = arith.constant 0 : index
    %130 = vector.load %129[%c1_91, %c0_92] : memref<2x128xf32, #tpu.memory_space<vmem>>, vector<1x128xf32>
    %131 = vector.shape_cast %130 : vector<1x128xf32> to vector<1x128xf32>
    %132 = vector.broadcast %131 : vector<1x128xf32> to vector<4x128xf32>
    %c0_i32_93 = arith.constant 0 : i32
    %c0_i32_94 = arith.constant 0 : i32
    %133 = tpu.memref_slice %arg4[%c1_i32_88, %c0_i32_93, %c0_i32_94] : memref<4x2x128xf32, #tpu.memory_space<vmem>> -> memref<1x2x128xf32, #tpu.memory_space<vmem>>
    %134 = tpu.memref_squeeze %133 : memref<1x2x128xf32, #tpu.memory_space<vmem>> -> memref<2x128xf32, #tpu.memory_space<vmem>>
    %c1_95 = arith.constant 1 : index
    %c0_96 = arith.constant 0 : index
    %135 = vector.load %134[%c1_95, %c0_96] : memref<2x128xf32, #tpu.memory_space<vmem>>, vector<1x128xf32>
    %136 = vector.shape_cast %135 : vector<1x128xf32> to vector<1x128xf32>
    %137 = vector.broadcast %136 : vector<1x128xf32> to vector<4x128xf32>
    %c0_i32_97 = arith.constant 0 : i32
    %c0_i32_98 = arith.constant 0 : i32
    %138 = tpu.memref_slice %arg5[%c1_i32_88, %c0_i32_97, %c0_i32_98] : memref<4x4x128xf32, #tpu.memory_space<vmem>> -> memref<1x4x128xf32, #tpu.memory_space<vmem>>
    %139 = tpu.memref_squeeze %138 : memref<1x4x128xf32, #tpu.memory_space<vmem>> -> memref<4x128xf32, #tpu.memory_space<vmem>>
    %c0_99 = arith.constant 0 : index
    %c0_100 = arith.constant 0 : index
    %140 = vector.load %139[%c0_99, %c0_100] : memref<4x128xf32, #tpu.memory_space<vmem>>, vector<4x128xf32>
    %c0_i32_101 = arith.constant 0 : i32
    %c0_i32_102 = arith.constant 0 : i32
    %141 = tpu.memref_slice %arg6[%c1_i32_88, %c0_i32_101, %c0_i32_102] : memref<4x4x128xf32, #tpu.memory_space<vmem>> -> memref<1x4x128xf32, #tpu.memory_space<vmem>>
    %142 = tpu.memref_squeeze %141 : memref<1x4x128xf32, #tpu.memory_space<vmem>> -> memref<4x128xf32, #tpu.memory_space<vmem>>
    %c0_103 = arith.constant 0 : index
    %c0_104 = arith.constant 0 : index
    %143 = vector.load %142[%c0_103, %c0_104] : memref<4x128xf32, #tpu.memory_space<vmem>>, vector<4x128xf32>
    %144 = arith.mulf %132, %140 : vector<4x128xf32>
    %145 = arith.mulf %137, %143 : vector<4x128xf32>
    %146 = arith.subf %144, %145 : vector<4x128xf32>
    %147 = arith.addf %123, %146 : vector<4x128xf32>
    %148 = arith.mulf %132, %143 : vector<4x128xf32>
    %149 = arith.mulf %137, %140 : vector<4x128xf32>
    %150 = arith.addf %148, %149 : vector<4x128xf32>
    %151 = arith.addf %127, %150 : vector<4x128xf32>
    %c2_i32_105 = arith.constant 2 : i32
    %c0_i32_106 = arith.constant 0 : i32
    %c0_i32_107 = arith.constant 0 : i32
    %152 = tpu.memref_slice %arg3[%c2_i32_105, %c0_i32_106, %c0_i32_107] : memref<4x2x128xf32, #tpu.memory_space<vmem>> -> memref<1x2x128xf32, #tpu.memory_space<vmem>>
    %153 = tpu.memref_squeeze %152 : memref<1x2x128xf32, #tpu.memory_space<vmem>> -> memref<2x128xf32, #tpu.memory_space<vmem>>
    %c1_108 = arith.constant 1 : index
    %c0_109 = arith.constant 0 : index
    %154 = vector.load %153[%c1_108, %c0_109] : memref<2x128xf32, #tpu.memory_space<vmem>>, vector<1x128xf32>
    %155 = vector.shape_cast %154 : vector<1x128xf32> to vector<1x128xf32>
    %156 = vector.broadcast %155 : vector<1x128xf32> to vector<4x128xf32>
    %c0_i32_110 = arith.constant 0 : i32
    %c0_i32_111 = arith.constant 0 : i32
    %157 = tpu.memref_slice %arg4[%c2_i32_105, %c0_i32_110, %c0_i32_111] : memref<4x2x128xf32, #tpu.memory_space<vmem>> -> memref<1x2x128xf32, #tpu.memory_space<vmem>>
    %158 = tpu.memref_squeeze %157 : memref<1x2x128xf32, #tpu.memory_space<vmem>> -> memref<2x128xf32, #tpu.memory_space<vmem>>
    %c1_112 = arith.constant 1 : index
    %c0_113 = arith.constant 0 : index
    %159 = vector.load %158[%c1_112, %c0_113] : memref<2x128xf32, #tpu.memory_space<vmem>>, vector<1x128xf32>
    %160 = vector.shape_cast %159 : vector<1x128xf32> to vector<1x128xf32>
    %161 = vector.broadcast %160 : vector<1x128xf32> to vector<4x128xf32>
    %c0_i32_114 = arith.constant 0 : i32
    %c0_i32_115 = arith.constant 0 : i32
    %162 = tpu.memref_slice %arg5[%c2_i32_105, %c0_i32_114, %c0_i32_115] : memref<4x4x128xf32, #tpu.memory_space<vmem>> -> memref<1x4x128xf32, #tpu.memory_space<vmem>>
    %163 = tpu.memref_squeeze %162 : memref<1x4x128xf32, #tpu.memory_space<vmem>> -> memref<4x128xf32, #tpu.memory_space<vmem>>
    %c0_116 = arith.constant 0 : index
    %c0_117 = arith.constant 0 : index
    %164 = vector.load %163[%c0_116, %c0_117] : memref<4x128xf32, #tpu.memory_space<vmem>>, vector<4x128xf32>
    %c0_i32_118 = arith.constant 0 : i32
    %c0_i32_119 = arith.constant 0 : i32
    %165 = tpu.memref_slice %arg6[%c2_i32_105, %c0_i32_118, %c0_i32_119] : memref<4x4x128xf32, #tpu.memory_space<vmem>> -> memref<1x4x128xf32, #tpu.memory_space<vmem>>
    %166 = tpu.memref_squeeze %165 : memref<1x4x128xf32, #tpu.memory_space<vmem>> -> memref<4x128xf32, #tpu.memory_space<vmem>>
    %c0_120 = arith.constant 0 : index
    %c0_121 = arith.constant 0 : index
    %167 = vector.load %166[%c0_120, %c0_121] : memref<4x128xf32, #tpu.memory_space<vmem>>, vector<4x128xf32>
    %168 = arith.mulf %156, %164 : vector<4x128xf32>
    %169 = arith.mulf %161, %167 : vector<4x128xf32>
    %170 = arith.subf %168, %169 : vector<4x128xf32>
    %171 = arith.addf %147, %170 : vector<4x128xf32>
    %172 = arith.mulf %156, %167 : vector<4x128xf32>
    %173 = arith.mulf %161, %164 : vector<4x128xf32>
    %174 = arith.addf %172, %173 : vector<4x128xf32>
    %175 = arith.addf %151, %174 : vector<4x128xf32>
    %c3_i32_122 = arith.constant 3 : i32
    %c0_i32_123 = arith.constant 0 : i32
    %c0_i32_124 = arith.constant 0 : i32
    %176 = tpu.memref_slice %arg3[%c3_i32_122, %c0_i32_123, %c0_i32_124] : memref<4x2x128xf32, #tpu.memory_space<vmem>> -> memref<1x2x128xf32, #tpu.memory_space<vmem>>
    %177 = tpu.memref_squeeze %176 : memref<1x2x128xf32, #tpu.memory_space<vmem>> -> memref<2x128xf32, #tpu.memory_space<vmem>>
    %c1_125 = arith.constant 1 : index
    %c0_126 = arith.constant 0 : index
    %178 = vector.load %177[%c1_125, %c0_126] : memref<2x128xf32, #tpu.memory_space<vmem>>, vector<1x128xf32>
    %179 = vector.shape_cast %178 : vector<1x128xf32> to vector<1x128xf32>
    %180 = vector.broadcast %179 : vector<1x128xf32> to vector<4x128xf32>
    %c0_i32_127 = arith.constant 0 : i32
    %c0_i32_128 = arith.constant 0 : i32
    %181 = tpu.memref_slice %arg4[%c3_i32_122, %c0_i32_127, %c0_i32_128] : memref<4x2x128xf32, #tpu.memory_space<vmem>> -> memref<1x2x128xf32, #tpu.memory_space<vmem>>
    %182 = tpu.memref_squeeze %181 : memref<1x2x128xf32, #tpu.memory_space<vmem>> -> memref<2x128xf32, #tpu.memory_space<vmem>>
    %c1_129 = arith.constant 1 : index
    %c0_130 = arith.constant 0 : index
    %183 = vector.load %182[%c1_129, %c0_130] : memref<2x128xf32, #tpu.memory_space<vmem>>, vector<1x128xf32>
    %184 = vector.shape_cast %183 : vector<1x128xf32> to vector<1x128xf32>
    %185 = vector.broadcast %184 : vector<1x128xf32> to vector<4x128xf32>
    %c0_i32_131 = arith.constant 0 : i32
    %c0_i32_132 = arith.constant 0 : i32
    %186 = tpu.memref_slice %arg5[%c3_i32_122, %c0_i32_131, %c0_i32_132] : memref<4x4x128xf32, #tpu.memory_space<vmem>> -> memref<1x4x128xf32, #tpu.memory_space<vmem>>
    %187 = tpu.memref_squeeze %186 : memref<1x4x128xf32, #tpu.memory_space<vmem>> -> memref<4x128xf32, #tpu.memory_space<vmem>>
    %c0_133 = arith.constant 0 : index
    %c0_134 = arith.constant 0 : index
    %188 = vector.load %187[%c0_133, %c0_134] : memref<4x128xf32, #tpu.memory_space<vmem>>, vector<4x128xf32>
    %c0_i32_135 = arith.constant 0 : i32
    %c0_i32_136 = arith.constant 0 : i32
    %189 = tpu.memref_slice %arg6[%c3_i32_122, %c0_i32_135, %c0_i32_136] : memref<4x4x128xf32, #tpu.memory_space<vmem>> -> memref<1x4x128xf32, #tpu.memory_space<vmem>>
    %190 = tpu.memref_squeeze %189 : memref<1x4x128xf32, #tpu.memory_space<vmem>> -> memref<4x128xf32, #tpu.memory_space<vmem>>
    %c0_137 = arith.constant 0 : index
    %c0_138 = arith.constant 0 : index
    %191 = vector.load %190[%c0_137, %c0_138] : memref<4x128xf32, #tpu.memory_space<vmem>>, vector<4x128xf32>
    %192 = arith.mulf %180, %188 : vector<4x128xf32>
    %193 = arith.mulf %185, %191 : vector<4x128xf32>
    %194 = arith.subf %192, %193 : vector<4x128xf32>
    %195 = arith.addf %171, %194 : vector<4x128xf32>
    %196 = arith.mulf %180, %191 : vector<4x128xf32>
    %197 = arith.mulf %185, %188 : vector<4x128xf32>
    %198 = arith.addf %196, %197 : vector<4x128xf32>
    %199 = arith.addf %175, %198 : vector<4x128xf32>
    %c4_i32_139 = arith.constant 4 : i32
    %200 = arith.extui %0 : i1 to i32
    %c1_i32_140 = arith.constant 1 : i32
    %c1_i32_141 = arith.constant 1 : i32
    %c0_i32_142 = arith.constant 0 : i32
    %201 = arith.cmpi ne, %200, %c0_i32_142 : i32
    scf.if %201 {
      %204 = arith.index_cast %c1_i32_140 : i32 to index
      %c0_146 = arith.constant 0 : index
      %c0_147 = arith.constant 0 : index
      %205 = vector.load %arg7[%204, %c0_146, %c0_147] : memref<2x4x128xf32, #tpu.memory_space<vmem>>, vector<1x4x128xf32>
      %206 = vector.shape_cast %205 : vector<1x4x128xf32> to vector<4x128xf32>
      %207 = vector.shape_cast %195 : vector<4x128xf32> to vector<1x4x128xf32>
      tpu.vector_store %arg7[%204, %c0_146, %c0_147], %207 {strides = array<i32>} : memref<2x4x128xf32, #tpu.memory_space<vmem>>, vector<1x4x128xf32>,
      %208 = arith.index_cast %c1_i32_141 : i32 to index
      %c0_148 = arith.constant 0 : index
      %c0_149 = arith.constant 0 : index
      %209 = vector.load %arg8[%208, %c0_148, %c0_149] : memref<2x4x128xf32, #tpu.memory_space<vmem>>, vector<1x4x128xf32>
      %210 = vector.shape_cast %209 : vector<1x4x128xf32> to vector<4x128xf32>
      %211 = vector.shape_cast %199 : vector<4x128xf32> to vector<1x4x128xf32>
      tpu.vector_store %arg8[%208, %c0_148, %c0_149], %211 {strides = array<i32>} : memref<2x4x128xf32, #tpu.memory_space<vmem>>, vector<1x4x128xf32>,
    } else {
    }
    %202 = arith.extui %1 : i1 to i32
    %c1_i32_143 = arith.constant 1 : i32
    %c1_i32_144 = arith.constant 1 : i32
    %c0_i32_145 = arith.constant 0 : i32
    %203 = arith.cmpi ne, %202, %c0_i32_145 : i32
    scf.if %203 {
      %204 = arith.index_cast %c1_i32_143 : i32 to index
      %c0_146 = arith.constant 0 : index
      %c0_147 = arith.constant 0 : index
      %205 = vector.load %arg7[%204, %c0_146, %c0_147] : memref<2x4x128xf32, #tpu.memory_space<vmem>>, vector<1x4x128xf32>
      %206 = vector.shape_cast %205 : vector<1x4x128xf32> to vector<4x128xf32>
      %207 = arith.addf %206, %195 : vector<4x128xf32>
      %208 = arith.index_cast %c1_i32_143 : i32 to index
      %c0_148 = arith.constant 0 : index
      %c0_149 = arith.constant 0 : index
      %209 = vector.load %arg7[%208, %c0_148, %c0_149] : memref<2x4x128xf32, #tpu.memory_space<vmem>>, vector<1x4x128xf32>
      %210 = vector.shape_cast %209 : vector<1x4x128xf32> to vector<4x128xf32>
      %211 = vector.shape_cast %207 : vector<4x128xf32> to vector<1x4x128xf32>
      tpu.vector_store %arg7[%208, %c0_148, %c0_149], %211 {strides = array<i32>} : memref<2x4x128xf32, #tpu.memory_space<vmem>>, vector<1x4x128xf32>,
      %212 = arith.index_cast %c1_i32_144 : i32 to index
      %c0_150 = arith.constant 0 : index
      %c0_151 = arith.constant 0 : index
      %213 = vector.load %arg8[%212, %c0_150, %c0_151] : memref<2x4x128xf32, #tpu.memory_space<vmem>>, vector<1x4x128xf32>
      %214 = vector.shape_cast %213 : vector<1x4x128xf32> to vector<4x128xf32>
      %215 = arith.addf %214, %199 : vector<4x128xf32>
      %216 = arith.index_cast %c1_i32_144 : i32 to index
      %c0_152 = arith.constant 0 : index
      %c0_153 = arith.constant 0 : index
      %217 = vector.load %arg8[%216, %c0_152, %c0_153] : memref<2x4x128xf32, #tpu.memory_space<vmem>>, vector<1x4x128xf32>
      %218 = vector.shape_cast %217 : vector<1x4x128xf32> to vector<4x128xf32>
      %219 = vector.shape_cast %215 : vector<4x128xf32> to vector<1x4x128xf32>
      tpu.vector_store %arg8[%216, %c0_152, %c0_153], %219 {strides = array<i32>} : memref<2x4x128xf32, #tpu.memory_space<vmem>>, vector<1x4x128xf32>,
    } else {
    }
    return
  }
  func.func @transform_0(%arg0: i32, %arg1: i32, %arg2: i32) -> (i32, i32, i32) {
    %c0_i32 = arith.constant 0 : i32
    %c0_i32_0 = arith.constant 0 : i32
    return %arg2, %c0_i32, %arg0 : i32, i32, i32
  }
  func.func @transform_1(%arg0: i32, %arg1: i32, %arg2: i32) -> (i32, i32, i32) {
    %c0_i32 = arith.constant 0 : i32
    %c0_i32_0 = arith.constant 0 : i32
    return %arg2, %c0_i32, %arg0 : i32, i32, i32
  }
  func.func @transform_2(%arg0: i32, %arg1: i32, %arg2: i32) -> (i32, i32, i32) {
    %c0_i32 = arith.constant 0 : i32
    return %arg2, %arg1, %arg0 : i32, i32, i32
  }
  func.func @transform_3(%arg0: i32, %arg1: i32, %arg2: i32) -> (i32, i32, i32) {
    %c0_i32 = arith.constant 0 : i32
    return %arg2, %arg1, %arg0 : i32, i32, i32
  }
  func.func @transform_4(%arg0: i32, %arg1: i32, %arg2: i32) -> (i32, i32, i32) {
    %c0_i32 = arith.constant 0 : i32
    %c0_i32_0 = arith.constant 0 : i32
    return %c0_i32, %arg1, %arg0 : i32, i32, i32
  }
  func.func @transform_5(%arg0: i32, %arg1: i32, %arg2: i32) -> (i32, i32, i32) {
    %c0_i32 = arith.constant 0 : i32
    %c0_i32_0 = arith.constant 0 : i32
    return %c0_i32, %arg1, %arg0 : i32, i32, i32
  }
}

</mosaic_0001>

<bundles_post_ra>
// kernel: reverse.1
= control target key start
LH: loop header
LB: loop body
LE: loop exit
PB: predicated region body
PF: predicated region fallthrough
CT: control target
= control target key end

     0   :  { %v71_v3 = vlaneseq  ;;  %v64_v9 = vld [vmem:[#allocation0 + $0x7] ss:$-1 sm:$0xff]  ;;  %v78_v12 = vld [vmem:[#allocation0 + $0x17] ss:$-1 sm:$0xff]  ;;  %s329_s0 = inlined_call_operand.vmem [shape: f32[2,4,16,7], index: 0, kind: input, shape index: {}]   ;;  %s330_s1 = inlined_call_operand.vmem [shape: f32[2,4,16,7], index: 1, kind: output, shape index: {}]  }
   0x1   :  { %v44_v0 = vld [vmem:[%s329_s0] sm:$0xff]  ;;  %v46_v1 = vld [vmem:[%s329_s0 + $0x8] sm:$0xff]  ;;  %v48_v2 = vld [vmem:[%s329_s0 + $0x10] sm:$0xff]  ;;  %v65_v10 = vrot.slane %v64_v9, 1  ;;  %v79_v14 = vrot.slane %v78_v12, 1 }
   0x2   :  { %45 = vst [vmem:[#allocation0 + $0x8] sm:$0xff] %v44_v0  ;;  %47 = vst [vmem:[#allocation0 + $0x18] sm:$0xff] %v46_v1  ;;  %v50_v4 = vld [vmem:[%s329_s0 + $0x18] sm:$0xff]  ;;  %v52_v5 = vld [vmem:[%s329_s0 + $0x20] sm:$0xff]  ;;  %v72_v11 = vshrl.u32 %v71_v3, 7 }
   0x3   :  { %49 = vst [vmem:[#allocation0 + $0x28] sm:$0xff] %v48_v2  ;;  %v54_v6 = vld [vmem:[%s329_s0 + $0x28] sm:$0xff]  ;;  %51 = vst [vmem:[#allocation0 + $0x38] sm:$0xff] %v50_v4  ;;  %v56_v7 = vld [vmem:[%s329_s0 + $0x30] sm:$0xff] }
   0x4   :  { %53 = vst [vmem:[#allocation0 + $0x48] sm:$0xff] %v52_v5  ;;  %55 = vst [vmem:[#allocation0 + $0x58] sm:$0xff] %v54_v6  ;;  %v58_v8 = vld [vmem:[%s329_s0 + $0x38] sm:$0xff]  ;;  %v92_v13 = vld [vmem:[#allocation0 + $0x27] ss:$-1 sm:$0xff]  ;;  %vm73_vm0 = vcmp.lt.s32.totalorder %v72_v11, 7 }
   0x5   :  { %57 = vst [vmem:[#allocation0 + $0x68] sm:$0xff] %v56_v7  ;;  %59 = vst [vmem:[#allocation0 + $0x78] sm:$0xff] %v58_v8  ;;  %v93_v15 = vrot.slane %v92_v13, 1  ;;  %v106_v16 = vld [vmem:[#allocation0 + $0x37] ss:$-1 sm:$0xff] }
   0x6   :  { %66 = vst [vmem:[#allocation1] sm:$0xff] %v65_v10  ;;  %v107_v17 = vrot.slane %v106_v16, 1  ;;  %v120_v18 = vld [vmem:[#allocation0 + $0x47] ss:$-1 sm:$0xff]  ;;  %v134_v19 = vld [vmem:[#allocation0 + $0x57] ss:$-1 sm:$0xff] }
   0x7   :  { %80 = vst [vmem:[#allocation1 + $0x8] sm:$0xff] %v79_v14  ;;  %94 = vst [vmem:[#allocation1 + $0x10] sm:$0xff] %v93_v15  ;;  %v121_v20 = vrot.slane %v120_v18, 1  ;;  %v135_v21 = vrot.slane %v134_v19, 1  ;;  %v148_v22 = vld [vmem:[#allocation0 + $0x67] ss:$-1 sm:$0xff] }
   0x8   :  { %v162_v23 = vld [vmem:[#allocation0 + $0x77] ss:$-1 sm:$0xff]  ;;  %108 = vst [vmem:[#allocation1 + $0x18] sm:$0xff] %v107_v17  ;;  %v149_v24 = vrot.slane %v148_v22, 1 }
   0x9   :  { %v163_v25 = vrot.slane %v162_v23, 1  ;;  %v69_v26 = vld [vmem:[#allocation0 + $0xf] ss:$-1 sm:$0xff]  ;;  %v83_v27 = vld [vmem:[#allocation0 + $0x1f] ss:$-1 sm:$0xff]  ;;  %122 = vst [vmem:[#allocation1 + $0x20] sm:$0xff] %v121_v20 }
   0xa   :  { %v97_v28 = vld [vmem:[#allocation0 + $0x2f] ss:$-1 sm:$0xff]  ;;  %136 = vst [vmem:[#allocation1 + $0x28] sm:$0xff] %v135_v21  ;;  %v70_v29 = vrot.slane %v69_v26, 1  ;;  %v84_v30 = vrot.slane %v83_v27, 1  ;;  %150 = vst [vmem:[#allocation1 + $0x30] sm:$0xff] %v149_v24 }
   0xb   :  { %v98_v31 = vrot.slane %v97_v28, 1  ;;  %v111_v32 = vld [vmem:[#allocation0 + $0x3f] ss:$-1 sm:$0xff]  ;;  %164 = vst [vmem:[#allocation1 + $0x38] sm:$0xff] %v163_v25  ;;  %v125_v34 = vld [vmem:[#allocation0 + $0x4f] ss:$-1 sm:$0xff] }
   0xc   :  { %v112_v33 = vrot.slane %v111_v32, 1  ;;  %v139_v35 = vld [vmem:[#allocation0 + $0x5f] ss:$-1 sm:$0xff]  ;;  %74 = vst.msk [vmem:[#allocation1] sm:$0xff] %vm73_vm0, %v70_v29  ;;  %88 = vst.msk [vmem:[#allocation1 + $0x8] sm:$0xff] %vm73_vm0, %v84_v30  ;;  %v126_v36 = vrot.slane %v125_v34, 1 }
   0xd   :  { %102 = vst.msk [vmem:[#allocation1 + $0x10] sm:$0xff] %vm73_vm0, %v98_v31  ;;  %v140_v37 = vrot.slane %v139_v35, 1  ;;  %v153_v38 = vld [vmem:[#allocation0 + $0x6f] ss:$-1 sm:$0xff]  ;;  %v167_v39 = vld [vmem:[#allocation0 + $0x7f] ss:$-1 sm:$0xff] }
   0xe   :  { %116 = vst.msk [vmem:[#allocation1 + $0x18] sm:$0xff] %vm73_vm0, %v112_v33  ;;  %v154_v40 = vrot.slane %v153_v38, 1  ;;  %v168_v41 = vrot.slane %v167_v39, 1  ;;  %130 = vst.msk [vmem:[#allocation1 + $0x20] sm:$0xff] %vm73_vm0, %v126_v36 }
   0xf   :  { %144 = vst.msk [vmem:[#allocation1 + $0x28] sm:$0xff] %vm73_vm0, %v140_v37 }
  0x10   :  { %158 = vst.msk [vmem:[#allocation1 + $0x30] sm:$0xff] %vm73_vm0, %v154_v40  ;;  %172 = vst.msk [vmem:[#allocation1 + $0x38] sm:$0xff] %vm73_vm0, %v168_v41 }
  0x13   :  { %v214_v42 = vld [vmem:[#allocation1] sm:$0xff]  ;;  %v216_v43 = vld [vmem:[#allocation1 + $0x8] sm:$0xff] }
  0x14   :  { %v218_v44 = vld [vmem:[#allocation1 + $0x10] sm:$0xff]  ;;  %215 = vst [vmem:[%s330_s1] sm:$0xff] %v214_v42  ;;  %217 = vst [vmem:[%s330_s1 + $0x8] sm:$0xff] %v216_v43 }
  0x15   :  { %219 = vst [vmem:[%s330_s1 + $0x10] sm:$0xff] %v218_v44  ;;  %v220_v45 = vld [vmem:[#allocation1 + $0x18] sm:$0xff]  ;;  %v222_v46 = vld [vmem:[#allocation1 + $0x20] sm:$0xff] }
  0x16   :  { %221 = vst [vmem:[%s330_s1 + $0x18] sm:$0xff] %v220_v45  ;;  %v224_v47 = vld [vmem:[#allocation1 + $0x28] sm:$0xff]  ;;  %223 = vst [vmem:[%s330_s1 + $0x20] sm:$0xff] %v222_v46 }
  0x17   :  { %225 = vst [vmem:[%s330_s1 + $0x28] sm:$0xff] %v224_v47  ;;  %v226_v48 = vld [vmem:[#allocation1 + $0x30] sm:$0xff]  ;;  %v228_v49 = vld [vmem:[#allocation1 + $0x38] sm:$0xff] }
  0x18   :  { %227 = vst [vmem:[%s330_s1 + $0x30] sm:$0xff] %v226_v48  ;;  %229 = vst [vmem:[%s330_s1 + $0x38] sm:$0xff] %v228_v49 }

// kernel: spectral_conv2d.1
= control target key start
LH: loop header
LB: loop body
LE: loop exit
PB: predicated region body
PF: predicated region fallthrough
CT: control target
= control target key end

     0   :  { %s417_s0 = inlined_call_operand.vmem [shape: f32[4,2,128], index: 0, kind: input, shape index: {}]   ;;  %s418_s1 = inlined_call_operand.vmem [shape: f32[4,2,128], index: 1, kind: input, shape index: {}]   ;;  %s419_s2 = inlined_call_operand.vmem [shape: f32[4,4,128], index: 2, kind: input, shape index: {}]   ;;  %s420_s3 = inlined_call_operand.vmem [shape: f32[4,4,128], index: 3, kind: input, shape index: {}]   ;;  %s421_s4 = inlined_call_operand.vmem [shape: f32[2,4,128], index: 4, kind: output, shape index: {0}]   ;;  %s422_s5 = inlined_call_operand.vmem [shape: f32[2,4,128], index: 5, kind: output, shape index: {1}]  }
   0x1   :  { %v233_v0 = vld [vmem:[%s417_s0] ss:$0 sm:$0xff]  ;;  %v236_v5 = vld [vmem:[%s417_s0 + $0x2] ss:$0 sm:$0xff]  ;;  %v239_v9 = vld [vmem:[%s419_s2 + $0x4] sm:$0xf] }
   0x2   :  { %v234_v1 = vld [vmem:[%s418_s1] ss:$0 sm:$0xff]  ;;  %v238_v6 = vld [vmem:[%s418_s1 + $0x2] ss:$0 sm:$0xff]  ;;  %v240_v10 = vld [vmem:[%s420_s3 + $0x4] sm:$0xf]  ;;  %v57_v13 = vmul.f32 %v239_v9, %v236_v5 }
   0x3   :  { %v31_v2 = vld [vmem:[%s419_s2] sm:$0xf]  ;;  %v242_v11 = vld [vmem:[%s417_s0 + $0x4] ss:$0 sm:$0xff]  ;;  %v58_v14 = vmul.f32 %v240_v10, %v238_v6  ;;  %v245_v16 = vld [vmem:[%s419_s2 + $0x8] sm:$0xf]  ;;  %v61_v18 = vmul.f32 %v240_v10, %v236_v5  ;;  %v62_v19 = vmul.f32 %v239_v9, %v238_v6 }
   0x4   :  { %v32_v3 = vld [vmem:[%s420_s3] sm:$0xf]  ;;  %v33_v4 = vmul.f32 %v233_v0, %v31_v2  ;;  %v38_v7 = vmul.f32 %v234_v1, %v31_v2  ;;  %v244_v15 = vld [vmem:[%s418_s1 + $0x4] ss:$0 sm:$0xff]  ;;  %v246_v17 = vld [vmem:[%s420_s3 + $0x8] sm:$0xf]  ;;  %v81_v21 = vmul.f32 %v245_v16, %v242_v11 }
   0x5   :  { %v34_v8 = vmul.f32 %v234_v1, %v32_v3  ;;  %v37_v12 = vmul.f32 %v233_v0, %v32_v3  ;;  %v82_v22 = vmul.f32 %v246_v17, %v244_v15  ;;  %v248_v23 = vld [vmem:[%s417_s0 + $0x6] ss:$0 sm:$0xff]  ;;  %v251_v25 = vld [vmem:[%s419_s2 + $0xc] sm:$0xf]  ;;  %v59_v27 = vsub.f32 %v57_v13, %v58_v14  ;;  %v253_v32 = vld [vmem:[%s417_s0 + $0x1] ss:$0 sm:$0xff] }
   0x6   :  { %v250_v24 = vld [vmem:[%s418_s1 + $0x6] ss:$0 sm:$0xff]  ;;  %v252_v28 = vld [vmem:[%s420_s3 + $0xc] sm:$0xf]  ;;  %v105_v29 = vmul.f32 %v251_v25, %v248_v23  ;;  %v63_v30 = vadd.f32 %v62_v19, %v61_v18  ;;  %v85_v31 = vmul.f32 %v246_v17, %v242_v11  ;;  %v254_v33 = vld [vmem:[%s418_s1 + $0x1] ss:$0 sm:$0xff]  ;;  %v86_v36 = vmul.f32 %v245_v16, %v244_v15 }
   0x7   :  { %v35_v20 = vsub.f32 %v33_v4, %v34_v8  ;;  %v39_v26 = vadd.f32 %v38_v7, %v37_v12  ;;  %v83_v34 = vsub.f32 %v81_v21, %v82_v22  ;;  %v106_v35 = vmul.f32 %v252_v28, %v250_v24  ;;  %v137_v38 = vld [vmem:[%s419_s2] sm:$0xf]  ;;  %v259_v46 = vld [vmem:[%s419_s2 + $0x4] sm:$0xf]  ;;  %v265_v54 = vld [vmem:[%s419_s2 + $0x8] sm:$0xf] }
   0x8   :  { %v109_v37 = vmul.f32 %v252_v28, %v248_v23  ;;  %v138_v39 = vld [vmem:[%s420_s3] sm:$0xf]  ;;  %v110_v43 = vmul.f32 %v251_v25, %v250_v24  ;;  %v139_v44 = vmul.f32 %v253_v32, %v137_v38  ;;  %v260_v47 = vld [vmem:[%s420_s3 + $0x4] sm:$0xf]  ;;  %v87_v49 = vadd.f32 %v86_v36, %v85_v31  ;;  %v266_v58 = vld [vmem:[%s420_s3 + $0x8] sm:$0xf] }
   0x9   :  { %v256_v40 = vld [vmem:[%s417_s0 + $0x3] ss:$0 sm:$0xff]  ;;  %v60_v41 = vadd.f32 %v59_v27, %v35_v20  ;;  %v64_v42 = vadd.f32 %v63_v30, %v39_v26  ;;  %v107_v48 = vsub.f32 %v105_v29, %v106_v35  ;;  %v140_v50 = vmul.f32 %v254_v33, %v138_v39  ;;  %v262_v52 = vld [vmem:[%s417_s0 + $0x5] ss:$0 sm:$0xff]  ;;  %v268_v60 = vld [vmem:[%s417_s0 + $0x7] ss:$0 sm:$0xff] }
   0xa   :  { %v258_v45 = vld [vmem:[%s418_s1 + $0x3] ss:$0 sm:$0xff]  ;;  %v159_v51 = vmul.f32 %v259_v46, %v256_v40  ;;  %v264_v53 = vld [vmem:[%s418_s1 + $0x5] ss:$0 sm:$0xff]  ;;  %v111_v56 = vadd.f32 %v110_v43, %v109_v37  ;;  %v179_v59 = vmul.f32 %v265_v54, %v262_v52  ;;  %v270_v61 = vld [vmem:[%s418_s1 + $0x7] ss:$0 sm:$0xff]  ;;  %v143_v3 = vmul.f32 %v253_v32, %v138_v39 }
   0xb   :  { %v84_v55 = vadd.f32 %v83_v34, %v60_v41  ;;  %v160_v57 = vmul.f32 %v260_v47, %v258_v45  ;;  %v88_v62 = vadd.f32 %v87_v49, %v64_v42  ;;  %v141_v63 = vsub.f32 %v139_v44, %v140_v50  ;;  %v271_v1 = vld [vmem:[%s419_s2 + $0xc] sm:$0xf] }
   0xc   :  { %v180_v0 = vmul.f32 %v266_v58, %v264_v53  ;;  %v272_v2 = vld [vmem:[%s420_s3 + $0xc] sm:$0xf]  ;;  %v199_v6 = vmul.f32 %v271_v1, %v268_v60  ;;  %v144_v10 = vmul.f32 %v254_v33, %v137_v38  ;;  %v163_v11 = vmul.f32 %v260_v47, %v256_v40 }
   0xd   :  { %v108_v4 = vadd.f32 %v107_v48, %v84_v55  ;;  %v161_v5 = vsub.f32 %v159_v51, %v160_v57  ;;  %v200_v7 = vmul.f32 %v272_v2, %v270_v61  ;;  %v112_v8 = vadd.f32 %v111_v56, %v88_v62 }
   0xe   :  { %v181_v9 = vsub.f32 %v179_v59, %v180_v0  ;;  %v164_v14 = vmul.f32 %v259_v46, %v258_v45  ;;  %v183_v15 = vmul.f32 %v266_v58, %v262_v52  ;;  %v145_v16 = vadd.f32 %v144_v10, %v143_v3 }
   0xf   :  { %116 = vst [vmem:[%s421_s4] sm:$0xf] %v108_v4  ;;  %v162_v12 = vadd.f32 %v161_v5, %v141_v63  ;;  %v201_v13 = vsub.f32 %v199_v6, %v200_v7  ;;  %117 = vst [vmem:[%s422_s5] sm:$0xf] %v112_v8  ;;  %v184_v17 = vmul.f32 %v265_v54, %v264_v53 }
  0x10   :  { %v203_v18 = vmul.f32 %v272_v2, %v268_v60  ;;  %v204_v19 = vmul.f32 %v271_v1, %v270_v61  ;;  %v165_v21 = vadd.f32 %v164_v14, %v163_v11 }
  0x11   :  { %v182_v20 = vadd.f32 %v181_v9, %v162_v12  ;;  %v185_v22 = vadd.f32 %v184_v17, %v183_v15 }
  0x12   :  { %v166_v24 = vadd.f32 %v165_v21, %v145_v16  ;;  %v205_v25 = vadd.f32 %v204_v19, %v203_v18 }
  0x13   :  { %v202_v23 = vadd.f32 %v201_v13, %v182_v20 }
  0x14   :  { %v186_v26 = vadd.f32 %v185_v22, %v166_v24 }
  0x15   :  { %273 = vst [vmem:[%s421_s4 + $0x4] sm:$0xf] %v202_v23 }
  0x16   :  { %v206_v27 = vadd.f32 %v205_v25, %v186_v26 }
  0x18   :  { %274 = vst [vmem:[%s422_s5 + $0x4] sm:$0xf] %v206_v27 }

</bundles_post_ra>
